<compile_context>
chip_gen: v7x
topology: tpu7x:2x2x1
jax: 0.10.0
libtpu: 0.0.40
codegen_flags: <defaults>
</compile_context>

<pallas_src>
import math

import jax
import jax.numpy as jnp
from jax import lax
from jax.experimental import pallas as pl
from jax.experimental.pallas import tpu as pltpu  # noqa: F401  (TPU backend / params if needed)

D_MODEL = 9
N_HEADS = 3
HEAD_SIZE = D_MODEL // N_HEADS  # 3

_Q_OFF = 0
_K_OFF = D_MODEL
_V_OFF = 2 * D_MODEL


def _make_mha_kernel(batch: int, seq: int):
    scale = 1.0 / math.sqrt(HEAD_SIZE)

    def kernel(x_ref, qkv_p_ref, o_p_ref, o_ref):
        # Whole problem in one shot: x is (B*S, D) resident in VMEM.
        x = x_ref[...]                                      # (B*S, D)

        qkv_p = qkv_p_ref[...]                              # (D+1, 3*D)
        w_qkv = qkv_p[:D_MODEL, :]                          # (D, 3*D)
        b_qkv = qkv_p[D_MODEL:, :]                          # (1, 3*D)

        o_p = o_p_ref[...]                                  # (D+1, D)
        w_o = o_p[:D_MODEL, :]                              # (D, D)
        b_o = o_p[D_MODEL:, :]                              # (1, D)

        # Single fused QKV projection for all batches / heads (one MXU matmul).
        qkv = jnp.dot(x, w_qkv, preferred_element_type=jnp.float32) + b_qkv  # (B*S, 3*D)

        batch_outs = []
        for b in range(batch):                              # static unroll (tiny B)
            r0 = b * seq
            # Accumulate the output projection per head: avoids a lane-dim
            # concat of width-3 head outputs.
            acc = jnp.zeros((seq, D_MODEL), dtype=jnp.float32)
            for h in range(N_HEADS):                        # static unroll (tiny)
                c = h * HEAD_SIZE
                q = qkv[r0:r0 + seq, _Q_OFF + c:_Q_OFF + c + HEAD_SIZE]  # (S, HS)
                k = qkv[r0:r0 + seq, _K_OFF + c:_K_OFF + c + HEAD_SIZE]  # (S, HS)
                v = qkv[r0:r0 + seq, _V_OFF + c:_V_OFF + c + HEAD_SIZE]  # (S, HS)

                # q @ k^T without materializing a transpose: contract last dims.
                s = lax.dot_general(
                    q, k, (((1,), (1,)), ((), ())),
                    preferred_element_type=jnp.float32) * scale           # (S, S)

                # Numerically-stable softmax; reciprocal-multiply (exact mode
                # so we match the PyTorch module to ~1e-5).
                m = jnp.max(s, axis=-1, keepdims=True)
                e = jnp.exp(s - m)
                inv = pl.reciprocal(jnp.sum(e, axis=-1, keepdims=True), approx=False)
                p = e * inv                                               # (S, S)

                pv = jnp.dot(p, v, preferred_element_type=jnp.float32)    # (S, HS)
                wo_h = w_o[c:c + HEAD_SIZE, :]                            # (HS, D)
                acc = acc + jnp.dot(pv, wo_h,
                                    preferred_element_type=jnp.float32)   # (S, D)

            batch_outs.append(acc + b_o)                                   # (S, D)

        # Row-axis concat (sublane-aligned: S is a whole number of rows) and a
        # single store of the full (B*S, D) result.
        out = jnp.concatenate(batch_outs, axis=0)                           # (B*S, D)
        o_ref[...] = out.astype(o_ref.dtype)

    return kernel


def multi_head_attention(x, wq, wk, wv, bq, bk, bv, wo, bo):
    B, S, D = x.shape
    assert D == D_MODEL

    # --- pack parameters in the wrapper (3 kernel inputs total) ---------------
    # W_qkv: (D, 3*D); column block [h*HS:(h+1)*HS] of each third equals W{q,k,v}[h].
    def _flat(w):  # (NH, D, HS) -> (D, NH*HS)
        return jnp.transpose(w, (1, 0, 2)).reshape(D_MODEL, N_HEADS * HEAD_SIZE)

    w_qkv = jnp.concatenate([_flat(wq), _flat(wk), _flat(wv)], axis=1)      # (9, 27)
    b_qkv = jnp.concatenate(
        [bq.reshape(1, -1), bk.reshape(1, -1), bv.reshape(1, -1)], axis=1)  # (1, 27)
    qkv_params = jnp.concatenate([w_qkv, b_qkv], axis=0)                    # (10, 27)

    w_o_cat = wo.reshape(N_HEADS * HEAD_SIZE, D_MODEL)                      # (9, 9)
    o_params = jnp.concatenate([w_o_cat, bo.reshape(1, D_MODEL)], axis=0)   # (10, 9)

    x2 = x.reshape(B * S, D_MODEL)

    out2 = pl.pallas_call(
        _make_mha_kernel(B, S),
        out_shape=jax.ShapeDtypeStruct((B * S, D_MODEL), x.dtype),
        # No grid: single invocation, full arrays resident in VMEM.
        in_specs=[
            pl.BlockSpec((B * S, D_MODEL), lambda: (0, 0)),                 # x
            pl.BlockSpec((D_MODEL + 1, 3 * D_MODEL), lambda: (0, 0)),       # qkv params
            pl.BlockSpec((D_MODEL + 1, D_MODEL), lambda: (0, 0)),           # out-proj params
        ],
        out_specs=pl.BlockSpec((B * S, D_MODEL), lambda: (0, 0)),
    )(x2, qkv_params, o_params)

    # TODO(synk): for real ViT shapes (S~197, D=768, 12 heads) re-tile over S with
    # lane-dense 128-multiple blocks, online softmax, and a parallel grid axis for
    # megacore; at D=9 everything fits in a single vreg tile anyway.
    return out2.reshape(B, S, D_MODEL)


def _reference(x, wq, wk, wv, bq, bk, bv, wo, bo):
    """Pure-JAX reference mirroring the PyTorch module."""
    outs = []
    scale = 1.0 / math.sqrt(HEAD_SIZE)
    for h in range(N_HEADS):
        q = x @ wq[h] + bq[h]
        k = x @ wk[h] + bk[h]
        v = x @ wv[h] + bv[h]
        s = jnp.einsum("bqd,bkd->bqk", q, k) * scale
        p = jax.nn.softmax(s, axis=-1)
        outs.append(jnp.einsum("bqk,bkd->bqd", p, v))
    cat = jnp.concatenate(outs, axis=-1)                     # (B, S, d_model)
    wo_cat = wo.reshape(N_HEADS * HEAD_SIZE, D_MODEL)        # (d_model, d_model)
    return cat @ wo_cat + bo[0]


if __name__ == "__main__":
    key = jax.random.PRNGKey(0)
    keys = jax.random.split(key, 10)

    B, S = 2, 8
    x = jax.random.normal(keys[0], (B, S, D_MODEL), dtype=jnp.float32)

    # Deterministic parameter init (uniform, roughly nn.Linear-style ranges).
    lim_in = 1.0 / math.sqrt(D_MODEL)
    wq = jax.random.uniform(keys[1], (N_HEADS, D_MODEL, HEAD_SIZE),
                            minval=-lim_in, maxval=lim_in, dtype=jnp.float32)
    wk = jax.random.uniform(keys[2], (N_HEADS, D_MODEL, HEAD_SIZE),
                            minval=-lim_in, maxval=lim_in, dtype=jnp.float32)
    wv = jax.random.uniform(keys[3], (N_HEADS, D_MODEL, HEAD_SIZE),
                            minval=-lim_in, maxval=lim_in, dtype=jnp.float32)
    bq = jax.random.uniform(keys[4], (N_HEADS, HEAD_SIZE),
                            minval=-lim_in, maxval=lim_in, dtype=jnp.float32)
    bk = jax.random.uniform(keys[5], (N_HEADS, HEAD_SIZE),
                            minval=-lim_in, maxval=lim_in, dtype=jnp.float32)
    bv = jax.random.uniform(keys[6], (N_HEADS, HEAD_SIZE),
                            minval=-lim_in, maxval=lim_in, dtype=jnp.float32)
    wo = jax.random.uniform(keys[7], (N_HEADS, HEAD_SIZE, D_MODEL),
                            minval=-lim_in, maxval=lim_in, dtype=jnp.float32)
    bo = jax.random.uniform(keys[8], (1, D_MODEL),
                            minval=-lim_in, maxval=lim_in, dtype=jnp.float32)

    out = multi_head_attention(x, wq, wk, wv, bq, bk, bv, wo, bo)
    out = jax.block_until_ready(out)

    ref = _reference(x, wq, wk, wv, bq, bk, bv, wo, bo)
    assert out.shape == (B, S, D_MODEL)
    assert jnp.allclose(out, ref, atol=1e-5, rtol=1e-5), "mismatch vs reference"
    print("KERNEL_OK")
</pallas_src>

<mosaic_0001>
module attributes {stable_mosaic.version = 11 : i64} {
  func.func @kernel(%arg0: memref<16x9xf32, #tpu.memory_space<vmem>>, %arg1: memref<10x27xf32, #tpu.memory_space<vmem>>, %arg2: memref<10x9xf32, #tpu.memory_space<vmem>>, %arg3: memref<16x9xf32, #tpu.memory_space<vmem>>) attributes {dimension_semantics = [], scalar_prefetch = 0 : i64, scratch_operands = 0 : i64, tpu.core_type = #tpu.core_type<tc>} {
    %c0 = arith.constant 0 : index
    %c0_0 = arith.constant 0 : index
    %0 = vector.load %arg0[%c0, %c0_0] : memref<16x9xf32, #tpu.memory_space<vmem>>, vector<16x9xf32>
    %c0_1 = arith.constant 0 : index
    %c0_2 = arith.constant 0 : index
    %1 = vector.load %arg1[%c0_1, %c0_2] : memref<10x27xf32, #tpu.memory_space<vmem>>, vector<10x27xf32>
    %2 = vector.extract_strided_slice %1 {offsets = [0, 0], sizes = [9, 27], strides = [1, 1]} : vector<10x27xf32> to vector<9x27xf32>
    %3 = vector.extract_strided_slice %1 {offsets = [9, 0], sizes = [1, 27], strides = [1, 1]} : vector<10x27xf32> to vector<1x27xf32>
    %c0_3 = arith.constant 0 : index
    %c0_4 = arith.constant 0 : index
    %4 = vector.load %arg2[%c0_3, %c0_4] : memref<10x9xf32, #tpu.memory_space<vmem>>, vector<10x9xf32>
    %5 = vector.extract_strided_slice %4 {offsets = [0, 0], sizes = [9, 9], strides = [1, 1]} : vector<10x9xf32> to vector<9x9xf32>
    %6 = vector.extract_strided_slice %4 {offsets = [9, 0], sizes = [1, 9], strides = [1, 1]} : vector<10x9xf32> to vector<1x9xf32>
    %cst = arith.constant dense<0.000000e+00> : vector<16x27xf32>
    %7 = tpu.matmul %0, %2, %cst {dimension_numbers = #tpu.dot_dimension_numbers<[1], [0], [0], [1], [0, 0, 1, 1], [], []>} : vector<16x9xf32>, vector<9x27xf32>, vector<16x27xf32> -> vector<16x27xf32>
    %8 = vector.broadcast %3 : vector<1x27xf32> to vector<16x27xf32>
    %9 = arith.addf %7, %8 : vector<16x27xf32>
    %cst_5 = arith.constant 0.000000e+00 : f32
    %10 = vector.broadcast %cst_5 : f32 to vector<8x9xf32>
    %11 = vector.extract_strided_slice %9 {offsets = [0, 0], sizes = [8, 3], strides = [1, 1]} : vector<16x27xf32> to vector<8x3xf32>
    %12 = vector.extract_strided_slice %9 {offsets = [0, 9], sizes = [8, 3], strides = [1, 1]} : vector<16x27xf32> to vector<8x3xf32>
    %13 = vector.extract_strided_slice %9 {offsets = [0, 18], sizes = [8, 3], strides = [1, 1]} : vector<16x27xf32> to vector<8x3xf32>
    %cst_6 = arith.constant dense<0.000000e+00> : vector<8x8xf32>
    %14 = tpu.matmul %11, %12, %cst_6 {dimension_numbers = #tpu.dot_dimension_numbers<[1], [1], [0], [0], [0, 0, 1, 0], [], []>} : vector<8x3xf32>, vector<8x3xf32>, vector<8x8xf32> -> vector<8x8xf32>
    %cst_7 = arith.constant 0.577350259 : f32
    %15 = vector.broadcast %cst_7 : f32 to vector<8x8xf32>
    %16 = arith.mulf %14, %15 : vector<8x8xf32>
    %cst_8 = arith.constant dense<0xFF800000> : vector<8xf32>
    %17 = vector.multi_reduction <maximumf>, %16, %cst_8 [1] : vector<8x8xf32> to vector<8xf32>
    %18 = vector.shape_cast %17 : vector<8xf32> to vector<8x1xf32>
    %19 = vector.broadcast %18 : vector<8x1xf32> to vector<8x8xf32>
    %20 = arith.subf %16, %19 : vector<8x8xf32>
    %21 = math.exp %20 : vector<8x8xf32>
    %cst_9 = arith.constant dense<0.000000e+00> : vector<8xf32>
    %22 = vector.multi_reduction <add>, %21, %cst_9 [1] : vector<8x8xf32> to vector<8xf32>
    %23 = vector.shape_cast %22 : vector<8xf32> to vector<8x1xf32>
    %24 = tpu.reciprocal %23 : vector<8x1xf32> -> vector<8x1xf32>
    %25 = vector.broadcast %24 : vector<8x1xf32> to vector<8x8xf32>
    %26 = arith.mulf %21, %25 : vector<8x8xf32>
    %cst_10 = arith.constant dense<0.000000e+00> : vector<8x3xf32>
    %27 = tpu.matmul %26, %13, %cst_10 {dimension_numbers = #tpu.dot_dimension_numbers<[1], [0], [0], [1], [0, 0, 1, 1], [], []>} : vector<8x8xf32>, vector<8x3xf32>, vector<8x3xf32> -> vector<8x3xf32>
    %28 = vector.extract_strided_slice %5 {offsets = [0, 0], sizes = [3, 9], strides = [1, 1]} : vector<9x9xf32> to vector<3x9xf32>
    %cst_11 = arith.constant dense<0.000000e+00> : vector<8x9xf32>
    %29 = tpu.matmul %27, %28, %cst_11 {dimension_numbers = #tpu.dot_dimension_numbers<[1], [0], [0], [1], [0, 0, 1, 1], [], []>} : vector<8x3xf32>, vector<3x9xf32>, vector<8x9xf32> -> vector<8x9xf32>
    %30 = arith.addf %10, %29 : vector<8x9xf32>
    %31 = vector.extract_strided_slice %9 {offsets = [0, 3], sizes = [8, 3], strides = [1, 1]} : vector<16x27xf32> to vector<8x3xf32>
    %32 = vector.extract_strided_slice %9 {offsets = [0, 12], sizes = [8, 3], strides = [1, 1]} : vector<16x27xf32> to vector<8x3xf32>
    %33 = vector.extract_strided_slice %9 {offsets = [0, 21], sizes = [8, 3], strides = [1, 1]} : vector<16x27xf32> to vector<8x3xf32>
    %cst_12 = arith.constant dense<0.000000e+00> : vector<8x8xf32>
    %34 = tpu.matmul %31, %32, %cst_12 {dimension_numbers = #tpu.dot_dimension_numbers<[1], [1], [0], [0], [0, 0, 1, 0], [], []>} : vector<8x3xf32>, vector<8x3xf32>, vector<8x8xf32> -> vector<8x8xf32>
    %cst_13 = arith.constant 0.577350259 : f32
    %35 = vector.broadcast %cst_13 : f32 to vector<8x8xf32>
    %36 = arith.mulf %34, %35 : vector<8x8xf32>
    %cst_14 = arith.constant dense<0xFF800000> : vector<8xf32>
    %37 = vector.multi_reduction <maximumf>, %36, %cst_14 [1] : vector<8x8xf32> to vector<8xf32>
    %38 = vector.shape_cast %37 : vector<8xf32> to vector<8x1xf32>
    %39 = vector.broadcast %38 : vector<8x1xf32> to vector<8x8xf32>
    %40 = arith.subf %36, %39 : vector<8x8xf32>
    %41 = math.exp %40 : vector<8x8xf32>
    %cst_15 = arith.constant dense<0.000000e+00> : vector<8xf32>
    %42 = vector.multi_reduction <add>, %41, %cst_15 [1] : vector<8x8xf32> to vector<8xf32>
    %43 = vector.shape_cast %42 : vector<8xf32> to vector<8x1xf32>
    %44 = tpu.reciprocal %43 : vector<8x1xf32> -> vector<8x1xf32>
    %45 = vector.broadcast %44 : vector<8x1xf32> to vector<8x8xf32>
    %46 = arith.mulf %41, %45 : vector<8x8xf32>
    %cst_16 = arith.constant dense<0.000000e+00> : vector<8x3xf32>
    %47 = tpu.matmul %46, %33, %cst_16 {dimension_numbers = #tpu.dot_dimension_numbers<[1], [0], [0], [1], [0, 0, 1, 1], [], []>} : vector<8x8xf32>, vector<8x3xf32>, vector<8x3xf32> -> vector<8x3xf32>
    %48 = vector.extract_strided_slice %5 {offsets = [3, 0], sizes = [3, 9], strides = [1, 1]} : vector<9x9xf32> to vector<3x9xf32>
    %cst_17 = arith.constant dense<0.000000e+00> : vector<8x9xf32>
    %49 = tpu.matmul %47, %48, %cst_17 {dimension_numbers = #tpu.dot_dimension_numbers<[1], [0], [0], [1], [0, 0, 1, 1], [], []>} : vector<8x3xf32>, vector<3x9xf32>, vector<8x9xf32> -> vector<8x9xf32>
    %50 = arith.addf %30, %49 : vector<8x9xf32>
    %51 = vector.extract_strided_slice %9 {offsets = [0, 6], sizes = [8, 3], strides = [1, 1]} : vector<16x27xf32> to vector<8x3xf32>
    %52 = vector.extract_strided_slice %9 {offsets = [0, 15], sizes = [8, 3], strides = [1, 1]} : vector<16x27xf32> to vector<8x3xf32>
    %53 = vector.extract_strided_slice %9 {offsets = [0, 24], sizes = [8, 3], strides = [1, 1]} : vector<16x27xf32> to vector<8x3xf32>
    %cst_18 = arith.constant dense<0.000000e+00> : vector<8x8xf32>
    %54 = tpu.matmul %51, %52, %cst_18 {dimension_numbers = #tpu.dot_dimension_numbers<[1], [1], [0], [0], [0, 0, 1, 0], [], []>} : vector<8x3xf32>, vector<8x3xf32>, vector<8x8xf32> -> vector<8x8xf32>
    %cst_19 = arith.constant 0.577350259 : f32
    %55 = vector.broadcast %cst_19 : f32 to vector<8x8xf32>
    %56 = arith.mulf %54, %55 : vector<8x8xf32>
    %cst_20 = arith.constant dense<0xFF800000> : vector<8xf32>
    %57 = vector.multi_reduction <maximumf>, %56, %cst_20 [1] : vector<8x8xf32> to vector<8xf32>
    %58 = vector.shape_cast %57 : vector<8xf32> to vector<8x1xf32>
    %59 = vector.broadcast %58 : vector<8x1xf32> to vector<8x8xf32>
    %60 = arith.subf %56, %59 : vector<8x8xf32>
    %61 = math.exp %60 : vector<8x8xf32>
    %cst_21 = arith.constant dense<0.000000e+00> : vector<8xf32>
    %62 = vector.multi_reduction <add>, %61, %cst_21 [1] : vector<8x8xf32> to vector<8xf32>
    %63 = vector.shape_cast %62 : vector<8xf32> to vector<8x1xf32>
    %64 = tpu.reciprocal %63 : vector<8x1xf32> -> vector<8x1xf32>
    %65 = vector.broadcast %64 : vector<8x1xf32> to vector<8x8xf32>
    %66 = arith.mulf %61, %65 : vector<8x8xf32>
    %cst_22 = arith.constant dense<0.000000e+00> : vector<8x3xf32>
    %67 = tpu.matmul %66, %53, %cst_22 {dimension_numbers = #tpu.dot_dimension_numbers<[1], [0], [0], [1], [0, 0, 1, 1], [], []>} : vector<8x8xf32>, vector<8x3xf32>, vector<8x3xf32> -> vector<8x3xf32>
    %68 = vector.extract_strided_slice %5 {offsets = [6, 0], sizes = [3, 9], strides = [1, 1]} : vector<9x9xf32> to vector<3x9xf32>
    %cst_23 = arith.constant dense<0.000000e+00> : vector<8x9xf32>
    %69 = tpu.matmul %67, %68, %cst_23 {dimension_numbers = #tpu.dot_dimension_numbers<[1], [0], [0], [1], [0, 0, 1, 1], [], []>} : vector<8x3xf32>, vector<3x9xf32>, vector<8x9xf32> -> vector<8x9xf32>
    %70 = arith.addf %50, %69 : vector<8x9xf32>
    %71 = vector.broadcast %6 : vector<1x9xf32> to vector<8x9xf32>
    %72 = arith.addf %70, %71 : vector<8x9xf32>
    %cst_24 = arith.constant 0.000000e+00 : f32
    %73 = vector.broadcast %cst_24 : f32 to vector<8x9xf32>
    %74 = vector.extract_strided_slice %9 {offsets = [8, 0], sizes = [8, 3], strides = [1, 1]} : vector<16x27xf32> to vector<8x3xf32>
    %75 = vector.extract_strided_slice %9 {offsets = [8, 9], sizes = [8, 3], strides = [1, 1]} : vector<16x27xf32> to vector<8x3xf32>
    %76 = vector.extract_strided_slice %9 {offsets = [8, 18], sizes = [8, 3], strides = [1, 1]} : vector<16x27xf32> to vector<8x3xf32>
    %cst_25 = arith.constant dense<0.000000e+00> : vector<8x8xf32>
    %77 = tpu.matmul %74, %75, %cst_25 {dimension_numbers = #tpu.dot_dimension_numbers<[1], [1], [0], [0], [0, 0, 1, 0], [], []>} : vector<8x3xf32>, vector<8x3xf32>, vector<8x8xf32> -> vector<8x8xf32>
    %cst_26 = arith.constant 0.577350259 : f32
    %78 = vector.broadcast %cst_26 : f32 to vector<8x8xf32>
    %79 = arith.mulf %77, %78 : vector<8x8xf32>
    %cst_27 = arith.constant dense<0xFF800000> : vector<8xf32>
    %80 = vector.multi_reduction <maximumf>, %79, %cst_27 [1] : vector<8x8xf32> to vector<8xf32>
    %81 = vector.shape_cast %80 : vector<8xf32> to vector<8x1xf32>
    %82 = vector.broadcast %81 : vector<8x1xf32> to vector<8x8xf32>
    %83 = arith.subf %79, %82 : vector<8x8xf32>
    %84 = math.exp %83 : vector<8x8xf32>
    %cst_28 = arith.constant dense<0.000000e+00> : vector<8xf32>
    %85 = vector.multi_reduction <add>, %84, %cst_28 [1] : vector<8x8xf32> to vector<8xf32>
    %86 = vector.shape_cast %85 : vector<8xf32> to vector<8x1xf32>
    %87 = tpu.reciprocal %86 : vector<8x1xf32> -> vector<8x1xf32>
    %88 = vector.broadcast %87 : vector<8x1xf32> to vector<8x8xf32>
    %89 = arith.mulf %84, %88 : vector<8x8xf32>
    %cst_29 = arith.constant dense<0.000000e+00> : vector<8x3xf32>
    %90 = tpu.matmul %89, %76, %cst_29 {dimension_numbers = #tpu.dot_dimension_numbers<[1], [0], [0], [1], [0, 0, 1, 1], [], []>} : vector<8x8xf32>, vector<8x3xf32>, vector<8x3xf32> -> vector<8x3xf32>
    %91 = vector.extract_strided_slice %5 {offsets = [0, 0], sizes = [3, 9], strides = [1, 1]} : vector<9x9xf32> to vector<3x9xf32>
    %cst_30 = arith.constant dense<0.000000e+00> : vector<8x9xf32>
    %92 = tpu.matmul %90, %91, %cst_30 {dimension_numbers = #tpu.dot_dimension_numbers<[1], [0], [0], [1], [0, 0, 1, 1], [], []>} : vector<8x3xf32>, vector<3x9xf32>, vector<8x9xf32> -> vector<8x9xf32>
    %93 = arith.addf %73, %92 : vector<8x9xf32>
    %94 = vector.extract_strided_slice %9 {offsets = [8, 3], sizes = [8, 3], strides = [1, 1]} : vector<16x27xf32> to vector<8x3xf32>
    %95 = vector.extract_strided_slice %9 {offsets = [8, 12], sizes = [8, 3], strides = [1, 1]} : vector<16x27xf32> to vector<8x3xf32>
    %96 = vector.extract_strided_slice %9 {offsets = [8, 21], sizes = [8, 3], strides = [1, 1]} : vector<16x27xf32> to vector<8x3xf32>
    %cst_31 = arith.constant dense<0.000000e+00> : vector<8x8xf32>
    %97 = tpu.matmul %94, %95, %cst_31 {dimension_numbers = #tpu.dot_dimension_numbers<[1], [1], [0], [0], [0, 0, 1, 0], [], []>} : vector<8x3xf32>, vector<8x3xf32>, vector<8x8xf32> -> vector<8x8xf32>
    %cst_32 = arith.constant 0.577350259 : f32
    %98 = vector.broadcast %cst_32 : f32 to vector<8x8xf32>
    %99 = arith.mulf %97, %98 : vector<8x8xf32>
    %cst_33 = arith.constant dense<0xFF800000> : vector<8xf32>
    %100 = vector.multi_reduction <maximumf>, %99, %cst_33 [1] : vector<8x8xf32> to vector<8xf32>
    %101 = vector.shape_cast %100 : vector<8xf32> to vector<8x1xf32>
    %102 = vector.broadcast %101 : vector<8x1xf32> to vector<8x8xf32>
    %103 = arith.subf %99, %102 : vector<8x8xf32>
    %104 = math.exp %103 : vector<8x8xf32>
    %cst_34 = arith.constant dense<0.000000e+00> : vector<8xf32>
    %105 = vector.multi_reduction <add>, %104, %cst_34 [1] : vector<8x8xf32> to vector<8xf32>
    %106 = vector.shape_cast %105 : vector<8xf32> to vector<8x1xf32>
    %107 = tpu.reciprocal %106 : vector<8x1xf32> -> vector<8x1xf32>
    %108 = vector.broadcast %107 : vector<8x1xf32> to vector<8x8xf32>
    %109 = arith.mulf %104, %108 : vector<8x8xf32>
    %cst_35 = arith.constant dense<0.000000e+00> : vector<8x3xf32>
    %110 = tpu.matmul %109, %96, %cst_35 {dimension_numbers = #tpu.dot_dimension_numbers<[1], [0], [0], [1], [0, 0, 1, 1], [], []>} : vector<8x8xf32>, vector<8x3xf32>, vector<8x3xf32> -> vector<8x3xf32>
    %111 = vector.extract_strided_slice %5 {offsets = [3, 0], sizes = [3, 9], strides = [1, 1]} : vector<9x9xf32> to vector<3x9xf32>
    %cst_36 = arith.constant dense<0.000000e+00> : vector<8x9xf32>
    %112 = tpu.matmul %110, %111, %cst_36 {dimension_numbers = #tpu.dot_dimension_numbers<[1], [0], [0], [1], [0, 0, 1, 1], [], []>} : vector<8x3xf32>, vector<3x9xf32>, vector<8x9xf32> -> vector<8x9xf32>
    %113 = arith.addf %93, %112 : vector<8x9xf32>
    %114 = vector.extract_strided_slice %9 {offsets = [8, 6], sizes = [8, 3], strides = [1, 1]} : vector<16x27xf32> to vector<8x3xf32>
    %115 = vector.extract_strided_slice %9 {offsets = [8, 15], sizes = [8, 3], strides = [1, 1]} : vector<16x27xf32> to vector<8x3xf32>
    %116 = vector.extract_strided_slice %9 {offsets = [8, 24], sizes = [8, 3], strides = [1, 1]} : vector<16x27xf32> to vector<8x3xf32>
    %cst_37 = arith.constant dense<0.000000e+00> : vector<8x8xf32>
    %117 = tpu.matmul %114, %115, %cst_37 {dimension_numbers = #tpu.dot_dimension_numbers<[1], [1], [0], [0], [0, 0, 1, 0], [], []>} : vector<8x3xf32>, vector<8x3xf32>, vector<8x8xf32> -> vector<8x8xf32>
    %cst_38 = arith.constant 0.577350259 : f32
    %118 = vector.broadcast %cst_38 : f32 to vector<8x8xf32>
    %119 = arith.mulf %117, %118 : vector<8x8xf32>
    %cst_39 = arith.constant dense<0xFF800000> : vector<8xf32>
    %120 = vector.multi_reduction <maximumf>, %119, %cst_39 [1] : vector<8x8xf32> to vector<8xf32>
    %121 = vector.shape_cast %120 : vector<8xf32> to vector<8x1xf32>
    %122 = vector.broadcast %121 : vector<8x1xf32> to vector<8x8xf32>
    %123 = arith.subf %119, %122 : vector<8x8xf32>
    %124 = math.exp %123 : vector<8x8xf32>
    %cst_40 = arith.constant dense<0.000000e+00> : vector<8xf32>
    %125 = vector.multi_reduction <add>, %124, %cst_40 [1] : vector<8x8xf32> to vector<8xf32>
    %126 = vector.shape_cast %125 : vector<8xf32> to vector<8x1xf32>
    %127 = tpu.reciprocal %126 : vector<8x1xf32> -> vector<8x1xf32>
    %128 = vector.broadcast %127 : vector<8x1xf32> to vector<8x8xf32>
    %129 = arith.mulf %124, %128 : vector<8x8xf32>
    %cst_41 = arith.constant dense<0.000000e+00> : vector<8x3xf32>
    %130 = tpu.matmul %129, %116, %cst_41 {dimension_numbers = #tpu.dot_dimension_numbers<[1], [0], [0], [1], [0, 0, 1, 1], [], []>} : vector<8x8xf32>, vector<8x3xf32>, vector<8x3xf32> -> vector<8x3xf32>
    %131 = vector.extract_strided_slice %5 {offsets = [6, 0], sizes = [3, 9], strides = [1, 1]} : vector<9x9xf32> to vector<3x9xf32>
    %cst_42 = arith.constant dense<0.000000e+00> : vector<8x9xf32>
    %132 = tpu.matmul %130, %131, %cst_42 {dimension_numbers = #tpu.dot_dimension_numbers<[1], [0], [0], [1], [0, 0, 1, 1], [], []>} : vector<8x3xf32>, vector<3x9xf32>, vector<8x9xf32> -> vector<8x9xf32>
    %133 = arith.addf %113, %132 : vector<8x9xf32>
    %134 = vector.broadcast %6 : vector<1x9xf32> to vector<8x9xf32>
    %135 = arith.addf %133, %134 : vector<8x9xf32>
    %136 = tpu.concatenate %72, %135 in 0 : vector<8x9xf32>, vector<8x9xf32> -> vector<16x9xf32>
    %c0_43 = arith.constant 0 : index
    %c0_44 = arith.constant 0 : index
    %137 = vector.load %arg3[%c0_43, %c0_44] : memref<16x9xf32, #tpu.memory_space<vmem>>, vector<16x9xf32>
    tpu.vector_store %arg3[%c0_43, %c0_44], %136 {strides = array<i32>} : memref<16x9xf32, #tpu.memory_space<vmem>>, vector<16x9xf32>,
    return
  }
}

</mosaic_0001>

<bundles_post_ra>
// kernel: tpu_custom_call.1
= control target key start
LH: loop header
LB: loop body
LE: loop exit
PB: predicated region body
PF: predicated region fallthrough
CT: control target
= control target key end

     0   :  { %8 = vsyncpa [#allocation3], 0  ;;  %s2209_s0 = inlined_call_operand.hbm [shape: f32[16,9], index: 0, kind: input, shape index: {}]   ;;  %s2210_s1 = inlined_call_operand.hbm [shape: f32[10,27], index: 1, kind: input, shape index: {}]   ;;  %s2211_s2 = inlined_call_operand.hbm [shape: f32[10,9], index: 2, kind: input, shape index: {}]   ;;  %s2212_s3 = inlined_call_operand.hbm [shape: f32[16,9], index: 3, kind: output, shape index: {}]  }
   0x1   :  { %9 = vsyncpa [#allocation6], 0 }
   0x2   :  { %10 = vsyncpa [#allocation4], 0  ;;  %s1939_s12 = smov [#allocation5]   ;;  %s1940_s14 = smov [#allocation2]  }
   0x3   :  { %s28_s13 = sshll.u32 %s1939_s12, 4  ;;  %s16_s15 = sshll.u32 %s1940_s14, 4  ;;  %s29_s13 = int_to_ptr.vmem [resolvable:$true] %s28_s13  ;;  %s1976_s15 = int_to_ptr.vmem [resolvable:$true] %s16_s15 }
   0x4   :  { %s1845_s18 = scalar_lea.hbm %s2210_s1, 256 }
   0x5   :  { %p1846_p0 = scmp.ne.s32.totalorder %s2210_s1, %s1845_s18  ;;  %p1849_p1 = scmp.lt.u32.totalorder %s1845_s18, %s2210_s1 }
   0x7   :  { %p1851_p2 = pnand %p1849_p1, %p1846_p0 }
   0x9   :  { %1854 = shalt.err (!%p1851_p2)
}
   0xa   :  { %s1855_s23 = scalar_lea.vmem %s29_s13, 256  ;;  %p1860_p4 = scmp.lt.s32.totalorder %s29_s13, %s29_s13 }
   0xb   :  { %p1856_p3 = scmp.ne.s32.totalorder %s29_s13, %s1855_s23  ;;  %p1861_p5 = scmp.lt.s32.totalorder %s1855_s23, %s1855_s23 }
   0xd   :  { %p1862_p6 = por %p1861_p5, %p1860_p4 }
   0xf   :  { %p1863_p7 = pnand %p1862_p6, %p1856_p3 }
  0x11   :  { %1866 = shalt.err (!%p1863_p7)
}
  0x12   :  { %s1941_s24 = smov 128   ;;  %s1942_s25 = smov 8  }
  0x13   :  { %34 = dma.hbm_to_vmem [thread:$0]  %s2210_s1, 256, %s29_s13, [#allocation6], %s1941_s24, %s1941_s24, %s1942_s25  }
  0x14   :  { %s1867_s30 = scalar_lea.hbm %s2209_s0, 256 }
  0x15   :  { %p1868_p8 = scmp.ne.s32.totalorder %s2209_s0, %s1867_s30  ;;  %p1871_p9 = scmp.lt.u32.totalorder %s1867_s30, %s2209_s0 }
  0x17   :  { %p1873_p10 = pnand %p1871_p9, %p1868_p8 }
  0x19   :  { %1876 = shalt.err (!%p1873_p10)
}
  0x1a   :  { %s1877_s8 = scalar_lea.vmem %s1976_s15, 256  ;;  %p1882_p12 = scmp.lt.s32.totalorder %s1976_s15, %s1976_s15 }
  0x1b   :  { %p1878_p11 = scmp.ne.s32.totalorder %s1976_s15, %s1877_s8  ;;  %p1883_p13 = scmp.lt.s32.totalorder %s1877_s8, %s1877_s8 }
  0x1d   :  { %p1884_p0 = por %p1883_p13, %p1882_p12 }
  0x1f   :  { %p1885_p1 = pnand %p1884_p0, %p1878_p11 }
  0x21   :  { %1888 = shalt.err (!%p1885_p1)
}
  0x22   :  { %22 = dma.hbm_to_vmem [thread:$0]  %s2209_s0, 256, %s1976_s15, [#allocation3], %s1941_s24, %s1941_s24, %s1942_s25  }
  0x23   :  { %s1943_s10 = smov [#allocation7]   ;;  %s1889_s14 = scalar_lea.hbm %s2211_s2, 256 }
  0x24   :  { %s40_s11 = sshll.u32 %s1943_s10, 4  ;;  %p1890_p2 = scmp.ne.s32.totalorder %s2211_s2, %s1889_s14  ;;  %s41_s11 = int_to_ptr.vmem [resolvable:$true] %s40_s11 }
  0x25   :  { %p1893_p3 = scmp.lt.u32.totalorder %s1889_s14, %s2211_s2 }
  0x27   :  { %p1895_p4 = pnand %p1893_p3, %p1890_p2 }
  0x29   :  { %1898 = shalt.err (!%p1895_p4)
}
  0x2a   :  { %s1899_s20 = scalar_lea.vmem %s41_s11, 256  ;;  %p1904_p6 = scmp.lt.s32.totalorder %s41_s11, %s41_s11 }
  0x2b   :  { %p1900_p5 = scmp.ne.s32.totalorder %s41_s11, %s1899_s20  ;;  %p1905_p7 = scmp.lt.s32.totalorder %s1899_s20, %s1899_s20 }
  0x2d   :  { %p1906_p8 = por %p1905_p7, %p1904_p6 }
  0x2f   :  { %p1907_p9 = pnand %p1906_p8, %p1900_p5 }
  0x31   :  { %1910 = shalt.err (!%p1907_p9)
}
  0x32   :  { %46 = dma.hbm_to_vmem [thread:$0]  %s2211_s2, 256, %s41_s11, [#allocation6], %s1941_s24, %s1941_s24, %s1942_s25  }
  0x33   :  { %1933 = dma.done.wait [#allocation3], 256  }
  0x34   :  { %1934 = vsyncadd [#allocation3], 4294967040 }
  0x35   :  { %1935 = dma.done.wait [#allocation6], 512  }
  0x36   :  { %1936 = vsyncadd [#allocation6], 4294966784  ;;  %vm73_vm0 = vcmask 1040384   ;;  %vm66_vm1 = vcmask 72704   ;;  %vm1944_vm2 = vmmov 1   ;;  %v58_v0 = vld [vmem:[#allocation5] sm:$0xff]  ;;  %v62_v6 = vlaneseq }
  0x37   :  { %vm1799_vm3 = vmpackc.low %vm73_vm0, %vm1944_vm2  ;;  %v59_v1 = vld [vmem:[#allocation5 + $0x8] sm:$0x3]  ;;  %v56_v2 = vld [vmem:[#allocation2] sm:$0xff]  ;;  %v1945_v5 = vmov 0.0   ;;  %vm1946_vm4 = vmmov 0   ;;  %s1947_s2 = smov 125  }
  0x38   :  { %v1798_v3 = vpack.c.bf16 %v59_v1, %v58_v0  ;;  %1705 = vmatprep.mubr.msk.f32.mxu0 %vm66_vm1, %v56_v2  ;;  %v57_v4 = vld [vmem:[#allocation2 + $0x8] sm:$0xff]  ;;  %1708 = vmatprep.subr.mxu1 %v1945_v5  ;;  %v2032_v7 = vshrl.u32 %v62_v6, 7  ;;  %s1948_s21 = smov 119   ;;  %s1949_s22 = smov 116   ;;  %vm155_vm5 = vcmask 23552   ;;  %vm231_vm6 = vcmask 64512  }
  0x39   :  { %1710 = vmatprep.mubr.msk.f32.mxu1 %vm1946_vm4, %v1945_v5  ;;  %s1950_s23 = smov 107   ;;  %s1951_s26 = smov 110   ;;  %v2074_v35 = vld [vmem:[#allocation7] sm:$0xff]  ;;  %vm490_vm7 = vcmask 1042432   ;;  %vm805_vm8 = vcmask 1041408  }
  0x3a   :  { %1800 = vmatprep.subr.msk.bf16.mxu0 %vm1799_vm3, %v1798_v3  ;;  %v64_v8 = vsub.s32 1, %v2032_v7  ;;  %s1952_s27 = smov 113   ;;  %s1953_s28 = smov 122   ;;  %v486_v36 = vrot.slane %v2074_v35, 3 }
  0x3b   :  { %1803 = vmatpush3.bf16.msk.msra.mxu0 %vm1799_vm3, %v1798_v3  ;;  %s1954_s29 = smov 104   ;;  %s1955_s30 = smov [#allocation8]  }
  0x3c   :  { %1713 = vmatprep.subr.mxu0 %v1945_v5  ;;  %v65_v9 = vrot.slane %v59_v1, %v64_v8  ;;  %s1615_s4 = sshll.u32 %s1955_s30, 4  ;;  %s1616_s4 = int_to_ptr.vmem [resolvable:$true] %s1615_s4 }
  0x3d   :  { %s1911_s5 = scalar_lea.vmem %s1616_s4, 256  ;;  %p1916_p11 = scmp.lt.s32.totalorder %s1616_s4, %s1616_s4 }
  0x3e   :  { %1706 = vmatmul.mubr.msk.f32.vlgmr.msra.gmra.mrb[0].mxu0 %vm66_vm1, %v57_v4  ;;  %p1912_p10 = scmp.ne.s32.totalorder %s1616_s4, %s1911_s5  ;;  %p1917_p12 = scmp.lt.s32.totalorder %s1911_s5, %s1911_s5 }
  0x3f   :  { %1715 = vmatprep.mubr.msk.f32.mxu0 %vm1946_vm4, %v1945_v5 }
  0x40   :  { %p1918_p13 = por %p1917_p12, %p1916_p11 }
  0x42   :  { %p1919_p0 = pnand %p1918_p13, %p1912_p10 }
 0x111   :  { %v1707_v10 = vpop.f32.mrb[0].mxu0 }
 0x112   :  { %v2041_v11 = vadd.f32 %v1707_v10, %v65_v9  ;;  %v143_v12 = vpop.f32.mrb[1].mxu0 }
 0x113   :  { %v2043_v13 = vadd.f32 %v143_v12, %v65_v9  ;;  %v61_v12 = vld [vmem:[#allocation7 + $0x8] sm:$0x3] }
 0x115   :  { %319 = vrot.lane.b32.xlu1 %v2043_v13, %s1947_s2  ;;  %153 = vrot.lane.b32.xlu0 %v2043_v13, %s1948_s21 }
 0x119   :  { %321 = vrot.lane.b32.xlu0 %v2043_v13, %s1949_s22 }
 0x187   :  { %v154_v14 = vpop.permute.xlu0 %153  ;;  %v320_v16 = vpop.permute.xlu1 %319 }
 0x188   :  { %1709 = vmatpush3.xpose.msk.msra.mxu1 %vm155_vm5, %v154_v14  ;;  %v807_v14 = vrot.slane %v61_v12, 6 }
 0x189   :  { %1718 = vmatprep.subr.mxu1 %v1945_v5 }
 0x18b   :  { %1711 = vmatmul.mubr.msk.f32.vlgmr.msra.gmra.mrb[0].mxu1 %vm155_vm5, %v2043_v13  ;;  %v322_v15 = vpop.permute.xlu0 %321 }
 0x18c   :  { %1719 = vmatpush3.xpose.msk.msra.mxu1 %vm155_vm5, %v322_v15  ;;  %1720 = vmatprep.mubr.msk.f32.mxu1 %vm1946_vm4, %v1945_v5 }
 0x18d   :  { %1728 = vmatprep.subr.mxu1 %v1945_v5 }
 0x18f   :  { %1721 = vmatmul.mubr.msk.f32.vlgmr.msra.gmra.mrb[2].mxu1 %vm155_vm5, %v320_v16 }
 0x190   :  { %1730 = vmatprep.mubr.msk.f32.mxu1 %vm1946_vm4, %v1945_v5  ;;  %1729 = vmatpush3.msk.msra.mxu1 %vm490_vm7, %v486_v36 }
 0x191   :  { %1738 = vmatprep.subr.mxu1 %v1945_v5 }
 0x25e   :  { %v226_v17 = vpop.f32.mrb[0].mxu1 }
 0x25f   :  { %v230_v18 = vmul.f32 0.57735026, %v226_v17  ;;  %v1712_v19 = vpop.f32.mrb[1].mxu1 }
 0x261   :  { %v232_v20 = vsel %vm231_vm6, %v230_v18, -inf }
 0x262   :  { %233 = vmax.xlane.f32.xlu1 %v232_v20  ;;  %v393_v21 = vpop.f32.mrb[2].mxu1 }
 0x263   :  { %v397_v22 = vmul.f32 0.57735026, %v393_v21  ;;  %v1722_v23 = vpop.f32.mrb[3].mxu1 }
 0x265   :  { %v398_v24 = vsel %vm231_vm6, %v397_v22, -inf }
 0x266   :  { %399 = vmax.xlane.f32.xlu0 %v398_v24 }
 0x2ef   :  { %v234_v25 = vpop.xlane.xlu1 %233 }
 0x2f0   :  { %v235_v26 = vsub.f32 %v230_v18, %v234_v25 }
 0x2f2   :  { %v236_v27 = vmul.f32 1.442695, %v235_v26 }
 0x2f3   :  { %v400_v28 = vpop.xlane.xlu0 %399 }
 0x2f4   :  { %1821 = vpow2.f32 %v236_v27  ;;  %v401_v29 = vsub.f32 %v397_v22, %v400_v28 }
 0x2f6   :  { %v402_v30 = vmul.f32 1.442695, %v401_v29 }
 0x2f8   :  { %1823 = vpow2.f32 %v402_v30 }
 0x2fe   :  { %v1822_v31 = vpop.eup %1821 }
 0x2ff   :  { %v238_v32 = vsel %vm231_vm6, %v1822_v31, 0.0 }
 0x300   :  { %239 = vadd.xlane.f32.xlu0 %v238_v32 }
 0x302   :  { %v1824_v33 = vpop.eup %1823 }
 0x303   :  { %v404_v34 = vsel %vm231_vm6, %v1824_v33, 0.0 }
 0x304   :  { %405 = vadd.xlane.f32.xlu1 %v404_v34 }
 0x315   :  { %409 = vrot.lane.b32.xlu1 %v2043_v13, %s1950_s23 }
 0x316   :  { %243 = vrot.lane.b32.xlu0 %v2043_v13, %s1951_s26 }
 0x319   :  { %640 = vrot.lane.b32.xlu1 %v2043_v13, %s1952_s27 }
 0x31a   :  { %638 = vrot.lane.b32.xlu0 %v2043_v13, %s1953_s28 }
 0x38d   :  { %v240_v37 = vpop.xlane.xlu0 %239 }
 0x38e   :  { %1825 = vrcp.f32 %v240_v37  ;;  %v2157_v37 = vrot.slane %v61_v12, %v64_v8 }
 0x391   :  { %v406_v38 = vpop.xlane.xlu1 %405  ;;  %v244_v39 = vpop.permute.xlu0 %243 }
 0x392   :  { %1827 = vrcp.f32 %v406_v38  ;;  %1714 = vmatpush3.msra.mxu0 %v244_v39 }
 0x393   :  { %1723 = vmatprep.subr.mxu0 %v1945_v5 }
 0x395   :  { %v410_v42 = vpop.permute.xlu1 %409  ;;  %v639_v50 = vpop.permute.xlu0 %638 }
 0x398   :  { %v1826_v40 = vpop.eup %1825 }
 0x399   :  { %v242_v41 = vmul.f32 %v1826_v40, %v1822_v31  ;;  %v641_v48 = vpop.permute.xlu1 %640 }
 0x39b   :  { %1716 = vmatmul.mubr.msk.f32.vlgmr.msra.gmra.mrb[2].mxu0 %vm231_vm6, %v242_v41 }
 0x39c   :  { %v1828_v43 = vpop.eup %1827  ;;  %1724 = vmatpush3.msra.mxu0 %v410_v42  ;;  %1725 = vmatprep.mubr.msk.f32.mxu0 %vm1946_vm4, %v1945_v5 }
 0x39d   :  { %v408_v44 = vmul.f32 %v1828_v43, %v1824_v33  ;;  %1733 = vmatprep.subr.mxu0 %v1945_v5 }
 0x39f   :  { %1726 = vmatmul.mubr.msk.f32.vlgmr.msra.gmra.mrb[4].mxu0 %vm231_vm6, %v408_v44 }
 0x3a0   :  { %1734 = vmatpush3.msk.msra.mxu0 %vm490_vm7, %v2074_v35  ;;  %1735 = vmatprep.mubr.msk.f32.mxu0 %vm1946_vm4, %v1945_v5 }
 0x3a1   :  { %1743 = vmatprep.subr.mxu0 %v1945_v5 }
 0x46e   :  { %v315_v45 = vpop.f32.mrb[2].mxu0 }
 0x46f   :  { %v1717_v46 = vpop.f32.mrb[3].mxu0  ;;  %1736 = vmatmul.mubr.msk.f32.vlgmr.msra.gmra.mrb[6].mxu0 %vm155_vm5, %v315_v45 }
 0x470   :  { %1745 = vmatprep.mubr.msk.f32.mxu0 %vm1946_vm4, %v1945_v5 }
 0x472   :  { %v481_v47 = vpop.f32.mrb[4].mxu0 }
 0x473   :  { %v1727_v49 = vpop.f32.mrb[5].mxu0  ;;  %1731 = vmatmul.mubr.msk.f32.vlgmr.msra.gmra.mrb[4].mxu1 %vm155_vm5, %v481_v47 }
 0x474   :  { %1739 = vmatpush3.xpose.msk.msra.mxu1 %vm155_vm5, %v641_v48  ;;  %1740 = vmatprep.mubr.msk.f32.mxu1 %vm1946_vm4, %v1945_v5 }
 0x475   :  { %1748 = vmatprep.subr.mxu1 %v1945_v5 }
 0x477   :  { %1741 = vmatmul.mubr.msk.f32.vlgmr.msra.gmra.mrb[6].mxu1 %vm155_vm5, %v639_v50 }
 0x478   :  { %1750 = vmatprep.mubr.msk.f32.mxu1 %vm1946_vm4, %v1945_v5 }
 0x542   :  { %v634_v51 = vpop.f32.mrb[6].mxu0 }
 0x543   :  { %v1737_v52 = vpop.f32.mrb[7].mxu0 }
 0x546   :  { %v559_v53 = vpop.f32.mrb[4].mxu1 }
 0x547   :  { %v2103_v54 = vadd.f32 %v634_v51, %v559_v53  ;;  %v1732_v55 = vpop.f32.mrb[5].mxu1 }
 0x54a   :  { %v712_v56 = vpop.f32.mrb[6].mxu1 }
 0x54b   :  { %v716_v57 = vmul.f32 0.57735026, %v712_v56  ;;  %v1742_v58 = vpop.f32.mrb[7].mxu1 }
 0x54d   :  { %v717_v59 = vsel %vm231_vm6, %v716_v57, -inf }
 0x54e   :  { %718 = vmax.xlane.f32.xlu1 %v717_v59 }
 0x55f   :  { %891 = vrot.lane.b32.xlu1 %v2041_v11, %s1948_s21 }
 0x563   :  { %1057 = vrot.lane.b32.xlu1 %v2041_v11, %s1949_s22 }
 0x5db   :  { %v719_v60 = vpop.xlane.xlu1 %718 }
 0x5dc   :  { %v720_v61 = vsub.f32 %v716_v57, %v719_v60 }
 0x5de   :  { %v721_v62 = vmul.f32 1.442695, %v720_v61 }
 0x5df   :  { %v892_v4 = vpop.permute.xlu1 %891 }
 0x5e0   :  { %1829 = vpow2.f32 %v721_v62 }
 0x5e3   :  { %v1058_v9 = vpop.permute.xlu1 %1057 }
 0x5ea   :  { %v1830_v63 = vpop.eup %1829 }
 0x5eb   :  { %v723_v0 = vsel %vm231_vm6, %v1830_v63, 0.0 }
 0x5ec   :  { %724 = vadd.xlane.f32.xlu0 %v723_v0 }
 0x602   :  { %728 = vrot.lane.b32.xlu0 %v2043_v13, %s1954_s29  ;;  %v806_v13 = vrot.slane %v2074_v35, 6 }
 0x604   :  { %v2135_v15 = vsel %vm805_vm8, %v806_v13, %v807_v14 }
 0x605   :  { %1749 = vmatpush3.msk.msra.mxu1 %vm490_vm7, %v2135_v15 }
 0x606   :  { %1055 = vrot.lane.b32.xlu0 %v2041_v11, %s1947_s2  ;;  %1758 = vmatprep.subr.mxu1 %v1945_v5 }
 0x679   :  { %v725_v1 = vpop.xlane.xlu0 %724 }
 0x67a   :  { %1831 = vrcp.f32 %v725_v1 }
 0x67d   :  { %v729_v2 = vpop.permute.xlu0 %728 }
 0x67e   :  { %1744 = vmatpush3.msra.mxu0 %v729_v2 }
 0x67f   :  { %1753 = vmatprep.subr.mxu0 %v1945_v5 }
 0x681   :  { %v1056_v10 = vpop.permute.xlu0 %1055 }
 0x684   :  { %v1832_v3 = vpop.eup %1831 }
 0x685   :  { %v727_v6 = vmul.f32 %v1832_v3, %v1830_v63 }
 0x687   :  { %1746 = vmatmul.mubr.msk.f32.vlgmr.msra.gmra.mrb[8].mxu0 %vm231_vm6, %v727_v6 }
 0x688   :  { %1754 = vmatpush3.xpose.msk.msra.mxu0 %vm155_vm5, %v892_v4  ;;  %1755 = vmatprep.mubr.msk.f32.mxu0 %vm1946_vm4, %v1945_v5 }
 0x689   :  { %1763 = vmatprep.subr.mxu0 %v1945_v5 }
 0x68b   :  { %1756 = vmatmul.mubr.msk.f32.vlgmr.msra.gmra.mrb[10].mxu0 %vm155_vm5, %v2041_v11 }
 0x68c   :  { %1764 = vmatpush3.xpose.msk.msra.mxu0 %vm155_vm5, %v1058_v9  ;;  %1765 = vmatprep.mubr.msk.f32.mxu0 %vm1946_vm4, %v1945_v5 }
 0x68d   :  { %1773 = vmatprep.subr.mxu0 %v1945_v5 }
 0x68f   :  { %1766 = vmatmul.mubr.msk.f32.vlgmr.msra.gmra.mrb[12].mxu0 %vm155_vm5, %v1056_v10 }
 0x690   :  { %1774 = vmatpush3.msk.msra.mxu0 %vm490_vm7, %v486_v36  ;;  %1775 = vmatprep.mubr.msk.f32.mxu0 %vm1946_vm4, %v1945_v5 }
 0x691   :  { %1783 = vmatprep.subr.mxu0 %v1945_v5 }
 0x75a   :  { %v800_v16 = vpop.f32.mrb[8].mxu0 }
 0x75b   :  { %v1747_v17 = vpop.f32.mrb[9].mxu0  ;;  %1751 = vmatmul.mubr.msk.f32.vlgmr.msra.gmra.mrb[8].mxu1 %vm155_vm5, %v800_v16 }
 0x75c   :  { %1760 = vmatprep.mubr.msk.f32.mxu1 %vm1946_vm4, %v1945_v5 }
 0x75e   :  { %v963_v18 = vpop.f32.mrb[10].mxu0 }
 0x75f   :  { %v967_v19 = vmul.f32 0.57735026, %v963_v18  ;;  %v1757_v20 = vpop.f32.mrb[11].mxu0 }
 0x761   :  { %v968_v21 = vsel %vm231_vm6, %v967_v19, -inf }
 0x762   :  { %969 = vmax.xlane.f32.xlu1 %v968_v21  ;;  %v1129_v22 = vpop.f32.mrb[12].mxu0 }
 0x763   :  { %v1133_v23 = vmul.f32 0.57735026, %v1129_v22  ;;  %v1767_v24 = vpop.f32.mrb[13].mxu0 }
 0x765   :  { %v1134_v25 = vsel %vm231_vm6, %v1133_v23, -inf }
 0x766   :  { %1135 = vmax.xlane.f32.xlu0 %v1134_v25 }
 0x7ef   :  { %v970_v26 = vpop.xlane.xlu1 %969 }
 0x7f0   :  { %v971_v27 = vsub.f32 %v967_v19, %v970_v26 }
 0x7f2   :  { %v972_v28 = vmul.f32 1.442695, %v971_v27 }
 0x7f3   :  { %v1136_v29 = vpop.xlane.xlu0 %1135 }
 0x7f4   :  { %1833 = vpow2.f32 %v972_v28  ;;  %v1137_v30 = vsub.f32 %v1133_v23, %v1136_v29 }
 0x7f6   :  { %v1138_v31 = vmul.f32 1.442695, %v1137_v30 }
 0x7f8   :  { %1835 = vpow2.f32 %v1138_v31 }
 0x7fe   :  { %v1834_v32 = vpop.eup %1833 }
 0x7ff   :  { %v974_v33 = vsel %vm231_vm6, %v1834_v32, 0.0 }
 0x800   :  { %975 = vadd.xlane.f32.xlu0 %v974_v33 }
 0x802   :  { %v1836_v34 = vpop.eup %1835 }
 0x803   :  { %v1140_v36 = vsel %vm231_vm6, %v1836_v34, 0.0 }
 0x804   :  { %1141 = vadd.xlane.f32.xlu1 %v1140_v36 }
 0x815   :  { %1145 = vrot.lane.b32.xlu1 %v2041_v11, %s1950_s23 }
 0x816   :  { %979 = vrot.lane.b32.xlu0 %v2041_v11, %s1951_s26 }
 0x819   :  { %1369 = vrot.lane.b32.xlu1 %v2041_v11, %s1952_s27 }
 0x81a   :  { %1367 = vrot.lane.b32.xlu0 %v2041_v11, %s1953_s28 }
 0x82e   :  { %v880_v38 = vpop.f32.mrb[8].mxu1 }
 0x82f   :  { %v884_v39 = vadd.f32 %v880_v38, %v2103_v54  ;;  %v1752_v40 = vpop.f32.mrb[9].mxu1 }
 0x831   :  { %v889_v41 = vadd.f32 %v2157_v37, %v884_v39 }
 0x833   :  { %1608 = vst.msk [vmem:[#allocation8] sm:$0xff] %vm66_vm1, %v889_v41 }
 0x88d   :  { %v976_v42 = vpop.xlane.xlu0 %975 }
 0x88e   :  { %1837 = vrcp.f32 %v976_v42 }
 0x891   :  { %v980_v43 = vpop.permute.xlu0 %979  ;;  %v1142_v44 = vpop.xlane.xlu1 %1141 }
 0x892   :  { %1839 = vrcp.f32 %v1142_v44  ;;  %1759 = vmatpush3.msra.mxu1 %v980_v43 }
 0x893   :  { %1768 = vmatprep.subr.mxu1 %v1945_v5 }
 0x895   :  { %v1146_v8 = vpop.permute.xlu1 %1145 }
 0x898   :  { %v1838_v45 = vpop.eup %1837 }
 0x899   :  { %v978_v7 = vmul.f32 %v1838_v45, %v1834_v32  ;;  %v1370_v51 = vpop.permute.xlu1 %1369 }
 0x89b   :  { %1761 = vmatmul.mubr.msk.f32.vlgmr.msra.gmra.mrb[10].mxu1 %vm231_vm6, %v978_v7 }
 0x89c   :  { %v1840_v46 = vpop.eup %1839  ;;  %1769 = vmatpush3.msra.mxu1 %v1146_v8  ;;  %1770 = vmatprep.mubr.msk.f32.mxu1 %vm1946_vm4, %v1945_v5 }
 0x89d   :  { %v1144_v47 = vmul.f32 %v1840_v46, %v1836_v34  ;;  %1778 = vmatprep.subr.mxu1 %v1945_v5 }
 0x89f   :  { %1771 = vmatmul.mubr.msk.f32.vlgmr.msra.gmra.mrb[12].mxu1 %vm231_vm6, %v1144_v47 }
 0x8a0   :  { %1779 = vmatpush3.msk.msra.mxu1 %vm490_vm7, %v2074_v35  ;;  %1780 = vmatprep.mubr.msk.f32.mxu1 %vm1946_vm4, %v1945_v5  ;;  %v1368_v35 = vpop.permute.xlu0 %1367 }
 0x8a1   :  { %1788 = vmatprep.subr.mxu1 %v1945_v5 }
 0x96e   :  { %v1051_v48 = vpop.f32.mrb[10].mxu1 }
 0x96f   :  { %v1762_v49 = vpop.f32.mrb[11].mxu1  ;;  %1781 = vmatmul.mubr.msk.f32.vlgmr.msra.gmra.mrb[14].mxu1 %vm155_vm5, %v1051_v48 }
 0x970   :  { %1790 = vmatprep.mubr.msk.f32.mxu1 %vm1946_vm4, %v1945_v5 }
 0x972   :  { %v1217_v50 = vpop.f32.mrb[12].mxu1 }
 0x973   :  { %v1772_v52 = vpop.f32.mrb[13].mxu1  ;;  %1776 = vmatmul.mubr.msk.f32.vlgmr.msra.gmra.mrb[14].mxu0 %vm155_vm5, %v1217_v50 }
 0x974   :  { %1784 = vmatpush3.xpose.msk.msra.mxu0 %vm155_vm5, %v1370_v51  ;;  %1785 = vmatprep.mubr.msk.f32.mxu0 %vm1946_vm4, %v1945_v5 }
 0x975   :  { %1793 = vmatprep.subr.mxu0 %v1945_v5 }
 0x977   :  { %1786 = vmatmul.mubr.msk.f32.vlgmr.msra.gmra.mrb[16].mxu0 %vm155_vm5, %v1368_v35 }
 0x978   :  { %1794 = vmatpush3.msk.msra.mxu0 %vm490_vm7, %v2135_v15  ;;  %1795 = vmatprep.mubr.msk.f32.mxu0 %vm1946_vm4, %v1945_v5 }
 0xa42   :  { %v1363_v53 = vpop.f32.mrb[14].mxu1 }
 0xa43   :  { %v1782_v54 = vpop.f32.mrb[15].mxu1 }
 0xa46   :  { %v1290_v55 = vpop.f32.mrb[14].mxu0 }
 0xa47   :  { %v1364_v56 = vadd.f32 %v1363_v53, %v1290_v55  ;;  %v1777_v57 = vpop.f32.mrb[15].mxu0 }
 0xa4a   :  { %v1441_v58 = vpop.f32.mrb[16].mxu0 }
 0xa4b   :  { %v1445_v59 = vmul.f32 0.57735026, %v1441_v58  ;;  %v1787_v60 = vpop.f32.mrb[17].mxu0 }
 0xa4d   :  { %v1446_v61 = vsel %vm231_vm6, %v1445_v59, -inf }
 0xa4e   :  { %1447 = vmax.xlane.f32.xlu1 %v1446_v61 }
 0xadb   :  { %v1448_v62 = vpop.xlane.xlu1 %1447 }
 0xadc   :  { %v1449_v63 = vsub.f32 %v1445_v59, %v1448_v62 }
 0xade   :  { %v1450_v0 = vmul.f32 1.442695, %v1449_v63 }
 0xae0   :  { %1841 = vpow2.f32 %v1450_v0 }
 0xaea   :  { %v1842_v1 = vpop.eup %1841 }
 0xaeb   :  { %v1452_v2 = vsel %vm231_vm6, %v1842_v1, 0.0 }
 0xaec   :  { %1453 = vadd.xlane.f32.xlu0 %v1452_v2 }
 0xb02   :  { %1457 = vrot.lane.b32.xlu0 %v2041_v11, %s1954_s29 }
 0xb79   :  { %v1454_v5 = vpop.xlane.xlu0 %1453 }
 0xb7a   :  { %1843 = vrcp.f32 %v1454_v5 }
 0xb7d   :  { %v1458_v3 = vpop.permute.xlu0 %1457 }
 0xb7e   :  { %1789 = vmatpush3.msra.mxu1 %v1458_v3 }
 0xb84   :  { %v1844_v4 = vpop.eup %1843 }
 0xb85   :  { %v1456_v6 = vmul.f32 %v1844_v4, %v1842_v1 }
 0xb87   :  { %1791 = vmatmul.mubr.msk.f32.vlgmr.msra.gmra.mrb[16].mxu1 %vm231_vm6, %v1456_v6 }
 0xc5a   :  { %v1529_v9 = vpop.f32.mrb[16].mxu1 }
 0xc5b   :  { %v1792_v10 = vpop.f32.mrb[17].mxu1  ;;  %1796 = vmatmul.mubr.msk.f32.vlgmr.msra.gmra.mrb[18].mxu0 %vm155_vm5, %v1529_v9 }
 0xd2e   :  { %v1602_v12 = vpop.f32.mrb[18].mxu0 }
 0xd2f   :  { %v1606_v13 = vadd.f32 %v1602_v12, %v1364_v56  ;;  %v1797_v14 = vpop.f32.mrb[19].mxu0 }
 0xd31   :  { %v1607_v15 = vadd.f32 %v1606_v13, %v2157_v37 }
 0xd33   :  { %1609 = vst.msk [vmem:[#allocation8 + $0x8] sm:$0xff] %vm66_vm1, %v1607_v15 }
 0xd34   :  { %1922 = shalt.err (!%p1919_p0)
}
 0xd35   :  { %s1923_s8 = scalar_lea.hbm %s2212_s3, 256 }
 0xd36   :  { %p1924_p1 = scmp.ne.s32.totalorder %s2212_s3, %s1923_s8  ;;  %p1927_p2 = scmp.lt.u32.totalorder %s1923_s8, %s2212_s3 }
 0xd38   :  { %p1929_p3 = pnand %p1927_p2, %p1924_p1 }
 0xd3a   :  { %1932 = shalt.err (!%p1929_p3)
}
 0xd3b   :  { %1621 = dma.vmem_to_hbm [thread:$0]  %s1616_s4, 256, %s2212_s3, [#allocation4], %s1941_s24, %s1941_s24, %s1942_s25  }
 0xd3c   :  { %1937 = dma.done.wait [#allocation4], 256  }
 0xd3d   :  { %1938 = vsyncadd [#allocation4], 4294967040 }
 0xd3e   :  { %1625 = vsyncpa [#allocation3], 1 }
 0xd3f   :  { %1626 = vsyncpa [#allocation6], 1 }
 0xd40   :  { %1627 = vsyncpa [#allocation4], 1 }

</bundles_post_ra>
